<compile_context>
chip_gen: v7x
topology: tpu7x:2x2x1
jax: 0.10.0
libtpu: 0.0.40
codegen_flags: <defaults>
</compile_context>

<pallas_src>
import jax
import jax.numpy as jnp
from jax.experimental import pallas as pl
from jax.experimental.pallas import tpu as pltpu

_LANE = 128
_ROW_ALIGN = 8


def _chip_defaults():
    """Return (vmem_limit_bytes, multi_tensorcore) for the current TPU generation."""
    kind = ""
    try:
        kind = jax.devices()[0].device_kind.lower()
    except Exception:
        pass
    multi_tc = "7" in kind  # v7x: 2 TensorCores/chip, 64 MiB VMEM per TC
    vmem_phys = None
    try:
        vmem_phys = int(getattr(pltpu.get_tpu_info(), "vmem_capacity_bytes", 0)) or None
    except Exception:
        vmem_phys = None
    if vmem_phys is None:
        vmem_phys = (64 if multi_tc else 128) * 1024 * 1024
    # ~25% headroom under physical capacity; 96 MiB on v5e/v6e, ~48 MiB on v7x.
    vmem_limit = min((vmem_phys * 3) // 4, 96 * 1024 * 1024)
    return int(vmem_limit), multi_tc


def _accurate_recip(s):
    # EUP vrcp (own VLIW slot, ~free) + two Newton-Raphson steps -> f32 accuracy.
    inv = pl.reciprocal(s, approx=True)
    inv = inv * (2.0 - s * inv)
    inv = inv * (2.0 - s * inv)
    # Match reference semantics when sum(exp) overflows: finite/inf == 0.
    return jnp.where(jnp.isinf(s), jnp.zeros_like(inv), inv)


# ---------------------------------------------------------------------------
# Fast path: entire column (all N rows) resident in one VMEM block.
# ---------------------------------------------------------------------------
def _softmax_full_kernel(x_ref, o_ref):
    # Faithful to the module: plain exp, no max-subtraction.
    e = jnp.exp(x_ref[...].astype(jnp.float32))
    s = jnp.sum(e, axis=0, keepdims=True)
    o_ref[...] = (e * _accurate_recip(s)).astype(o_ref.dtype)


# ---------------------------------------------------------------------------
# Large-N path: pass 1 accumulates column sums across row tiles.
# ---------------------------------------------------------------------------
def _make_colsum_kernel(orig_n, row_tile, need_row_mask):
    def kernel(x_ref, s_ref):
        @pl.when(pl.program_id(1) == 0)
        def _():
            s_ref[...] = jnp.zeros_like(s_ref)

        e = jnp.exp(x_ref[...].astype(jnp.float32))
        if need_row_mask:
            # Ragged last row block: mask out-of-bounds rows instead of padding
            # the input in HBM (saves a full extra read+write pass over x).
            rows = (jax.lax.broadcasted_iota(jnp.int32, e.shape, 0)
                    + pl.program_id(1) * row_tile)
            e = jnp.where(rows < orig_n, e, 0.0)
        s_ref[...] += jnp.sum(e, axis=0, keepdims=True)
    return kernel


# Pass 2: normalize each row tile with the precomputed column sums.
# TODO(synk): if EUP (exp) becomes the binding slot on v7x bf16 at 3.2 TB/s,
# restructure pass 1 to write e=exp(x) and rescale it in place in pass 2 via
# input_output_aliases (exp computed once instead of twice).
def _normalize_kernel(x_ref, s_ref, o_ref):
    e = jnp.exp(x_ref[...].astype(jnp.float32))
    o_ref[...] = (e * _accurate_recip(s_ref[...])).astype(o_ref.dtype)


def softmax_axis0(x, *, block_budget_bytes=None, vmem_limit_bytes=None):
    """Column-wise softmax (normalize over axis 0) of a 2-D array."""
    orig_n, orig_d = x.shape
    itemsize = jnp.dtype(x.dtype).itemsize
    auto_limit, multi_tc = _chip_defaults()
    if vmem_limit_bytes is None:
        vmem_limit_bytes = auto_limit
    if block_budget_bytes is None:
        # ~80% of the scoped limit is available for the working block set.
        block_budget_bytes = (int(vmem_limit_bytes) * 4) // 5

    # Resident bytes per block element: 2x double-buffered input + 2x output
    # (+ ~2 f32-sized elementwise temps).  f32 I/O -> 24 B, bf16 I/O -> 16 B.
    bytes_per_elem = 4 * itemsize + 8
    elems_per_block = max(_ROW_ALIGN * _LANE, block_budget_bytes // bytes_per_elem)
    d_blocks = pl.cdiv(orig_d, _LANE)
    cparams = dict(vmem_limit_bytes=int(vmem_limit_bytes))

    # Fast-path cutoff from the real (per-generation) VMEM budget.
    min_col = orig_d if orig_d < _LANE else _LANE
    full_col_fits = orig_n * min_col * bytes_per_elem <= block_budget_bytes

    if full_col_fits:
        # ---- fast path: one block holds all N rows of a wide column tile ----
        max_cb = max(1, elems_per_block // (orig_n * _LANE))
        if multi_tc and d_blocks >= 2:
            # >=2 column blocks so both v7x TensorCores get work.
            # TODO(synk): verify "parallel" shards this axis across both v7x TCs
            # in xprof; if not, switch to pltpu.CORE_PARALLEL here.
            max_cb = min(max_cb, (d_blocks + 1) // 2)
        cb = max(1, min(max_cb, d_blocks))
        col_tile = cb * _LANE
        if col_tile >= orig_d:
            col_tile = orig_d          # full-dim block: legal for any D, no ragged lanes
        n_col = pl.cdiv(orig_d, col_tile)

        return pl.pallas_call(
            _softmax_full_kernel,
            out_shape=jax.ShapeDtypeStruct((orig_n, orig_d), x.dtype),
            grid_spec=pltpu.PrefetchScalarGridSpec(
                num_scalar_prefetch=0,
                grid=(n_col,),
                in_specs=[pl.BlockSpec((orig_n, col_tile), lambda j: (0, j))],
                out_specs=pl.BlockSpec((orig_n, col_tile), lambda j: (0, j)),
            ),
            compiler_params=pltpu.CompilerParams(
                dimension_semantics=("parallel",), **cparams),
        )(x)

    # ---- large-N path: row-tiled two-pass (column sums, then normalize) ----
    cb_cap = 16                         # up to 2048-lane column tiles
    if multi_tc and d_blocks >= 2:
        cb_cap = min(cb_cap, (d_blocks + 1) // 2)   # keep >=2 col blocks on v7x
    cb = max(1, min(cb_cap, d_blocks, elems_per_block // (_ROW_ALIGN * _LANE)))
    col_tile = cb * _LANE
    if col_tile >= orig_d:
        col_tile = orig_d
    n_col = pl.cdiv(orig_d, col_tile)
    sum_width = n_col * col_tile        # tiny f32 intermediate, no big-array padding

    row_cap = max(_ROW_ALIGN,
                  (elems_per_block // col_tile) // _ROW_ALIGN * _ROW_ALIGN)
    row_tile = min(row_cap, pl.cdiv(orig_n, _ROW_ALIGN) * _ROW_ALIGN)
    n_row = pl.cdiv(orig_n, row_tile)
    need_row_mask = (orig_n % row_tile) != 0

    # Pass 1: per-column sum of exp, accumulated across row tiles.
    sums = pl.pallas_call(
        _make_colsum_kernel(orig_n, row_tile, need_row_mask),
        out_shape=jax.ShapeDtypeStruct((1, sum_width), jnp.float32),
        grid_spec=pltpu.PrefetchScalarGridSpec(
            num_scalar_prefetch=0,
            grid=(n_col, n_row),                         # reduction axis last
            in_specs=[pl.BlockSpec((row_tile, col_tile), lambda j, k: (k, j))],
            out_specs=pl.BlockSpec((1, col_tile), lambda j, k: (0, j)),
        ),
        compiler_params=pltpu.CompilerParams(
            dimension_semantics=("parallel", "arbitrary"), **cparams),
    )(x)

    # Pass 2: normalize (recompute exp; both axes independent -> parallel).
    return pl.pallas_call(
        _normalize_kernel,
        out_shape=jax.ShapeDtypeStruct((orig_n, orig_d), x.dtype),
        grid_spec=pltpu.PrefetchScalarGridSpec(
            num_scalar_prefetch=0,
            grid=(n_col, n_row),
            in_specs=[pl.BlockSpec((row_tile, col_tile), lambda j, k: (k, j)),
                      pl.BlockSpec((1, col_tile), lambda j, k: (0, j))],
            out_specs=pl.BlockSpec((row_tile, col_tile), lambda j, k: (k, j)),
        ),
        compiler_params=pltpu.CompilerParams(
            dimension_semantics=("parallel", "parallel"), **cparams),
    )(x, sums)


def softmax_axis0_ref(x):
    e = jnp.exp(x.astype(jnp.float32))
    return (e / jnp.sum(e, axis=0, keepdims=True)).astype(x.dtype)


if __name__ == "__main__":
    key = jax.random.PRNGKey(0)
    # Small shape consistent with the forward: seq=8, hidden=32.
    x = jax.random.normal(key, (8, 32), dtype=jnp.float32)

    out = jax.block_until_ready(softmax_axis0(x))
    ref = softmax_axis0_ref(x)
    assert out.shape == x.shape and out.dtype == x.dtype
    assert jnp.allclose(out, ref, atol=1e-5, rtol=1e-5)
    # Columns must sum to 1.
    assert jnp.allclose(jnp.sum(out, axis=0), jnp.ones((x.shape[1],)), atol=1e-5)

    # Unaligned D on the fast path (ragged last column block handled in-kernel,
    # no wrapper-side pad/slice passes).
    x1 = jax.random.normal(jax.random.PRNGKey(1), (13, 300), dtype=jnp.float32)
    out1 = jax.block_until_ready(softmax_axis0(x1))
    assert jnp.allclose(out1, softmax_axis0_ref(x1), atol=1e-5, rtol=1e-5)

    # Force the large-N two-pass path with a tiny budget (ragged rows + cols).
    x2 = jax.random.normal(jax.random.PRNGKey(2), (70, 300), dtype=jnp.float32)
    out2 = jax.block_until_ready(softmax_axis0(x2, block_budget_bytes=32 * 1024))
    assert jnp.allclose(out2, softmax_axis0_ref(x2), atol=1e-5, rtol=1e-5)

    # Aligned large-N path.
    x3 = jax.random.normal(jax.random.PRNGKey(3), (64, 256), dtype=jnp.float32)
    out3 = jax.block_until_ready(softmax_axis0(x3, block_budget_bytes=64 * 1024))
    assert jnp.allclose(out3, softmax_axis0_ref(x3), atol=1e-5, rtol=1e-5)

    print("KERNEL_OK")
</pallas_src>

<mosaic_0001>
module attributes {stable_mosaic.version = 11 : i64} {
  func.func @_softmax_full_kernel(%arg0: i32, %arg1: memref<8x32xf32, #tpu.memory_space<vmem>>, %arg2: memref<8x32xf32, #tpu.memory_space<vmem>>) attributes {dimension_semantics = [#tpu.dimension_semantics<parallel>], iteration_bounds = array<i64: 1>, scalar_prefetch = 0 : i64, scratch_operands = 0 : i64, tpu.core_type = #tpu.core_type<tc>, window_params = [{transform_indices = @transform_0, window_bounds = array<i64: 8, 32>}, {transform_indices = @transform_1, window_bounds = array<i64: 8, 32>}]} {
    %c0 = arith.constant 0 : index
    %c0_0 = arith.constant 0 : index
    %0 = vector.load %arg1[%c0, %c0_0] : memref<8x32xf32, #tpu.memory_space<vmem>>, vector<8x32xf32>
    %1 = math.exp %0 : vector<8x32xf32>
    %cst = arith.constant dense<0.000000e+00> : vector<32xf32>
    %2 = vector.multi_reduction <add>, %1, %cst [0] : vector<8x32xf32> to vector<32xf32>
    %3 = vector.shape_cast %2 : vector<32xf32> to vector<1x32xf32>
    %4 = tpu.reciprocal %3 {approx = true} : vector<1x32xf32> -> vector<1x32xf32>
    %5 = arith.mulf %3, %4 : vector<1x32xf32>
    %cst_1 = arith.constant 2.000000e+00 : f32
    %6 = vector.broadcast %cst_1 : f32 to vector<1x32xf32>
    %7 = arith.subf %6, %5 : vector<1x32xf32>
    %8 = arith.mulf %4, %7 : vector<1x32xf32>
    %9 = arith.mulf %3, %8 : vector<1x32xf32>
    %cst_2 = arith.constant 2.000000e+00 : f32
    %10 = vector.broadcast %cst_2 : f32 to vector<1x32xf32>
    %11 = arith.subf %10, %9 : vector<1x32xf32>
    %12 = arith.mulf %8, %11 : vector<1x32xf32>
    %13 = math.absf %3 : vector<1x32xf32>
    %cst_3 = arith.constant 0x7F800000 : f32
    %14 = vector.broadcast %cst_3 : f32 to vector<1x32xf32>
    %15 = arith.cmpf oeq, %13, %14 : vector<1x32xf32>
    %cst_4 = arith.constant 0.000000e+00 : f32
    %16 = vector.broadcast %cst_4 : f32 to vector<1x32xf32>
    %17 = arith.select %15, %16, %12 : vector<1x32xi1>, vector<1x32xf32>
    %18 = vector.broadcast %17 : vector<1x32xf32> to vector<8x32xf32>
    %19 = arith.mulf %1, %18 : vector<8x32xf32>
    %c0_5 = arith.constant 0 : index
    %c0_6 = arith.constant 0 : index
    %20 = vector.load %arg2[%c0_5, %c0_6] : memref<8x32xf32, #tpu.memory_space<vmem>>, vector<8x32xf32>
    tpu.vector_store %arg2[%c0_5, %c0_6], %19 {strides = array<i32>} : memref<8x32xf32, #tpu.memory_space<vmem>>, vector<8x32xf32>,
    return
  }
  func.func @transform_0(%arg0: i32) -> (i32, i32) {
    %c0_i32 = arith.constant 0 : i32
    %c0_i32_0 = arith.constant 0 : i32
    return %c0_i32, %arg0 : i32, i32
  }
  func.func @transform_1(%arg0: i32) -> (i32, i32) {
    %c0_i32 = arith.constant 0 : i32
    %c0_i32_0 = arith.constant 0 : i32
    return %c0_i32, %arg0 : i32, i32
  }
}

</mosaic_0001>

<bundles_post_ra>
// kernel: tpu_custom_call.1
= control target key start
LH: loop header
LB: loop body
LE: loop exit
PB: predicated region body
PF: predicated region fallthrough
CT: control target
= control target key end

     0   :  { %6 = vsyncpa [#allocation3], 0  ;;  %s151_s0 = inlined_call_operand.hbm [shape: f32[8,32], index: 0, kind: input, shape index: {}]   ;;  %s152_s1 = inlined_call_operand.hbm [shape: f32[8,32], index: 1, kind: output, shape index: {}]  }
   0x1   :  { %7 = vsyncpa [#allocation4], 0  ;;  %s113_s6 = smov [#allocation2]   ;;  %s65_s10 = scalar_lea.hbm %s151_s0, 128 }
   0x2   :  { %s14_s7 = sshll.u32 %s113_s6, 4  ;;  %p66_p0 = scmp.ne.s32.totalorder %s151_s0, %s65_s10  ;;  %s15_s7 = int_to_ptr.vmem [resolvable:$true] %s14_s7 }
   0x3   :  { %p69_p1 = scmp.lt.u32.totalorder %s65_s10, %s151_s0 }
   0x5   :  { %p71_p2 = pnand %p69_p1, %p66_p0 }
   0x7   :  { %74 = shalt.err (!%p71_p2)
}
   0x8   :  { %s75_s15 = scalar_lea.vmem %s15_s7, 128  ;;  %p80_p4 = scmp.lt.s32.totalorder %s15_s7, %s15_s7 }
   0x9   :  { %p76_p3 = scmp.ne.s32.totalorder %s15_s7, %s75_s15  ;;  %p81_p5 = scmp.lt.s32.totalorder %s75_s15, %s75_s15 }
   0xb   :  { %p82_p6 = por %p81_p5, %p80_p4 }
   0xd   :  { %p83_p7 = pnand %p82_p6, %p76_p3 }
   0xf   :  { %86 = shalt.err (!%p83_p7)
}
  0x10   :  { %17 = dma.hbm_to_vmem [thread:$0]  %s151_s0, 128, %s15_s7, [#allocation3]  }
  0x11   :  { %109 = dma.done.wait [#allocation3], 128  }
  0x12   :  { %110 = vsyncadd [#allocation3], 4294967168  ;;  %v21_v0 = vld [vmem:[#allocation2] sm:$0xff]  ;;  %vm24_vm0 = vcmask 261120   ;;  %s114_s0 = smov [#allocation5]  }
  0x13   :  { %v22_v1 = vmul.f32 1.442695, %v21_v0  ;;  %s50_s18 = sshll.u32 %s114_s0, 4  ;;  %s51_s18 = int_to_ptr.vmem [resolvable:$true] %s50_s18 }
  0x14   :  { %s87_s19 = scalar_lea.vmem %s51_s18, 128  ;;  %p92_p9 = scmp.lt.s32.totalorder %s51_s18, %s51_s18 }
  0x15   :  { %61 = vpow2.f32 %v22_v1  ;;  %p88_p8 = scmp.ne.s32.totalorder %s51_s18, %s87_s19  ;;  %p93_p10 = scmp.lt.s32.totalorder %s87_s19, %s87_s19 }
  0x17   :  { %p94_p11 = por %p93_p10, %p92_p9 }
  0x19   :  { %p95_p12 = pnand %p94_p11, %p88_p8 }
  0x1f   :  { %v62_v2 = vpop.eup %61 }
  0x20   :  { %v25_v3 = vsel %vm24_vm0, %v62_v2, 0.0 }
  0x21   :  { %v26_v4 = vrot.slane %v25_v3, 4 }
  0x23   :  { %v27_v5 = vadd.f32 %v26_v4, %v25_v3 }
  0x25   :  { %v28_v6 = vrot.slane %v27_v5, 2 }
  0x27   :  { %v29_v7 = vadd.f32 %v28_v6, %v27_v5 }
  0x29   :  { %v30_v8 = vrot.slane %v29_v7, 1 }
  0x2b   :  { %v31_v9 = vadd.f32 %v30_v8, %v29_v7 }
  0x2d   :  { %63 = vrcp.f32 %v31_v9  ;;  %v39_v14 = vand.u32 2147483647, %v31_v9 }
  0x2f   :  { %vm40_vm1 = vcmp.eq.f32.partialorder %v39_v14, inf }
  0x37   :  { %v64_v10 = vpop.eup %63 }
  0x38   :  { %v33_v11 = vmul.f32 %v64_v10, %v31_v9 }
  0x3a   :  { %v34_v12 = vsub.f32 2.0, %v33_v11 }
  0x3c   :  { %v35_v13 = vmul.f32 %v64_v10, %v34_v12 }
  0x3e   :  { %v36_v15 = vmul.f32 %v35_v13, %v31_v9 }
  0x40   :  { %v37_v16 = vsub.f32 2.0, %v36_v15 }
  0x42   :  { %v38_v17 = vmul.f32 %v37_v16, %v35_v13 }
  0x44   :  { %v41_v18 = vsel %vm40_vm1, 0.0, %v38_v17 }
  0x45   :  { %v42_v19 = vmul.f32 %v62_v2, %v41_v18 }
  0x47   :  { %43 = vst.msk [vmem:[#allocation5] sm:$0xff] %vm24_vm0, %v42_v19 }
  0x48   :  { %98 = shalt.err (!%p95_p12)
}
  0x49   :  { %s99_s22 = scalar_lea.hbm %s152_s1, 128 }
  0x4a   :  { %p100_p13 = scmp.ne.s32.totalorder %s152_s1, %s99_s22  ;;  %p103_p0 = scmp.lt.u32.totalorder %s99_s22, %s152_s1 }
  0x4c   :  { %p105_p1 = pnand %p103_p0, %p100_p13 }
  0x4e   :  { %108 = shalt.err (!%p105_p1)
}
  0x4f   :  { %53 = dma.vmem_to_hbm [thread:$0]  %s51_s18, 128, %s152_s1, [#allocation4]  }
  0x50   :  { %111 = dma.done.wait [#allocation4], 128  }
  0x51   :  { %112 = vsyncadd [#allocation4], 4294967168 }
  0x52   :  { %57 = vsyncpa [#allocation3], 1 }
  0x53   :  { %58 = vsyncpa [#allocation4], 1 }

</bundles_post_ra>
